<compile_context>
chip_gen: v5e
topology: v5e:2x2
jax: 0.10.0
libtpu: 0.0.40
codegen_flags: <defaults>
</compile_context>

<pallas_src>
import math

import jax
import jax.numpy as jnp
from jax.experimental import pallas as pl
from jax.experimental.pallas import tpu as pltpu


def _round_up(x, m):
    return ((x + m - 1) // m) * m


def _fourier_mlp_kernel(t_ref, sfreqs_ref, w1c_ref, w1s_ref, b1_ref,
                        w2_ref, b2_ref, out_ref):
    # t_ref: (TILE_N, 1) f32 timesteps; sfreqs_ref: (1, half) pre-scaled freqs.
    t = t_ref[...].astype(jnp.float32)
    args = t * sfreqs_ref[...]                                   # (TILE_N, half)
    c = jnp.cos(args)
    s = jnp.sin(args)

    # Linear(fourier_dim -> E_pad) without materializing [cos|sin] concat.
    h = (jnp.dot(c, w1c_ref[...], preferred_element_type=jnp.float32)
         + jnp.dot(s, w1s_ref[...], preferred_element_type=jnp.float32)
         + b1_ref[...])
    h = jnp.maximum(h, 0.0)                                      # ReLU

    out = jnp.dot(h, w2_ref[...], preferred_element_type=jnp.float32) + b2_ref[...]
    out_ref[...] = out.astype(out_ref.dtype)                     # lane-dense store


def fourier_time_embedder(t, params, *, fourier_dim, time_embed_dim,
                          num_timesteps=0, time_scale=1.0, max_period=10000.0,
                          tile_n=1024):
    """t: [N] float timesteps -> [N, time_embed_dim] float32 embeddings."""
    N = int(t.shape[0])
    half = fourier_dim // 2
    E = time_embed_dim
    E_pad = _round_up(max(E, 128), 128)          # lane-dense feature width

    w1, b1, w2, b2 = params                      # w1:(F,E) b1:(1,E)/(E,) w2:(E,E) b2

    # Fold the constant scale into the frequency table (host-side).
    scale = time_scale / max(num_timesteps, 1)
    sfreqs = (scale * jnp.exp(
        -math.log(max_period) * jnp.arange(half, dtype=jnp.float32) / half
    )).reshape(1, half)

    # Split w1 into cos/sin halves; drop the odd-pad weight row (zero column).
    w1 = w1.astype(jnp.float32)
    w1c = w1[:half]
    w1s = w1[half:2 * half]

    def pad_cols(a):
        return jnp.pad(a.astype(jnp.float32), ((0, 0), (0, E_pad - a.shape[1])))

    w1c_p = pad_cols(w1c)                                        # (half, E_pad)
    w1s_p = pad_cols(w1s)                                        # (half, E_pad)
    b1_p = pad_cols(b1.reshape(1, E))                            # (1, E_pad)
    w2_p = jnp.pad(w2.astype(jnp.float32),
                   ((0, E_pad - E), (0, E_pad - E)))             # (E_pad, E_pad)
    b2_p = pad_cols(b2.reshape(1, E))                            # (1, E_pad)

    # Row tiling (pad N up to a tile multiple; sublane-aligned).
    TILE_N = min(tile_n, _round_up(N, 8))
    N_pad = _round_up(N, TILE_N)
    t2d = jnp.pad(t.astype(jnp.float32).reshape(N, 1), ((0, N_pad - N), (0, 0)))

    grid = (N_pad // TILE_N,)

    out = pl.pallas_call(
        _fourier_mlp_kernel,
        out_shape=jax.ShapeDtypeStruct((N_pad, E_pad), jnp.float32),
        grid=grid,
        in_specs=[
            pl.BlockSpec((TILE_N, 1), lambda i: (i, 0)),         # t rows, tiled
            pl.BlockSpec((1, half), lambda i: (0, 0)),           # freqs, resident
            pl.BlockSpec((half, E_pad), lambda i: (0, 0)),       # w1_cos, resident
            pl.BlockSpec((half, E_pad), lambda i: (0, 0)),       # w1_sin, resident
            pl.BlockSpec((1, E_pad), lambda i: (0, 0)),          # b1, resident
            pl.BlockSpec((E_pad, E_pad), lambda i: (0, 0)),      # w2, resident
            pl.BlockSpec((1, E_pad), lambda i: (0, 0)),          # b2, resident
        ],
        out_specs=pl.BlockSpec((TILE_N, E_pad), lambda i: (i, 0)),
        compiler_params=pltpu.CompilerParams(
            dimension_semantics=("parallel",)),
    )(t2d, sfreqs, w1c_p, w1s_p, b1_p, w2_p, b2_p)

    return out[:N, :E]


def _reference(t, params, *, fourier_dim, time_embed_dim,
               num_timesteps=0, time_scale=1.0, max_period=10000.0):
    """Pure-JAX reference mirroring the PyTorch forward, for verification."""
    w1, b1, w2, b2 = params
    half = fourier_dim // 2
    scaled = time_scale * t.astype(jnp.float32) / max(num_timesteps, 1)
    freqs = jnp.exp(-math.log(max_period) * jnp.arange(half, dtype=jnp.float32) / half)
    args = scaled[..., None] * freqs[None, :]
    emb = jnp.concatenate([jnp.cos(args), jnp.sin(args)], axis=-1)
    if fourier_dim % 2:
        emb = jnp.concatenate([emb, jnp.zeros_like(emb[:, :1])], axis=-1)
    h = jnp.maximum(emb @ w1 + b1, 0.0)
    return h @ w2 + b2


if __name__ == "__main__":
    # Small, deterministic configuration.
    fourier_dim = 32
    time_embed_dim = 64
    num_timesteps = 1000
    time_scale = 1.0
    max_period = 10000.0

    key = jax.random.PRNGKey(0)
    k_t, k_w1, k_b1, k_w2, k_b2 = jax.random.split(key, 5)

    # Deterministic "Linear" parameters (stored as (in, out)).
    s1 = 1.0 / math.sqrt(fourier_dim)
    s2 = 1.0 / math.sqrt(time_embed_dim)
    w1 = jax.random.uniform(k_w1, (fourier_dim, time_embed_dim), jnp.float32, -s1, s1)
    b1 = jax.random.uniform(k_b1, (1, time_embed_dim), jnp.float32, -s1, s1)
    w2 = jax.random.uniform(k_w2, (time_embed_dim, time_embed_dim), jnp.float32, -s2, s2)
    b2 = jax.random.uniform(k_b2, (1, time_embed_dim), jnp.float32, -s2, s2)
    params = (w1, b1, w2, b2)

    # Case 1: small N (single tile).
    N = 8
    t = jax.random.uniform(k_t, (N,), jnp.float32) * num_timesteps
    out = fourier_time_embedder(
        t, params,
        fourier_dim=fourier_dim, time_embed_dim=time_embed_dim,
        num_timesteps=num_timesteps, time_scale=time_scale, max_period=max_period,
    )
    out = jax.block_until_ready(out)
    ref = _reference(
        t, params,
        fourier_dim=fourier_dim, time_embed_dim=time_embed_dim,
        num_timesteps=num_timesteps, time_scale=time_scale, max_period=max_period,
    )
    assert out.shape == (N, time_embed_dim)
    assert jnp.allclose(out, ref, atol=1e-5, rtol=1e-5), "mismatch vs reference (N=8)"

    # Case 2: N not a multiple of the tile, multiple grid steps (exercises
    # padding + pipelined row grid).
    N2 = 300
    t2 = jax.random.uniform(k_t, (N2,), jnp.float32) * num_timesteps
    out2 = fourier_time_embedder(
        t2, params,
        fourier_dim=fourier_dim, time_embed_dim=time_embed_dim,
        num_timesteps=num_timesteps, time_scale=time_scale, max_period=max_period,
        tile_n=128,
    )
    out2 = jax.block_until_ready(out2)
    ref2 = _reference(
        t2, params,
        fourier_dim=fourier_dim, time_embed_dim=time_embed_dim,
        num_timesteps=num_timesteps, time_scale=time_scale, max_period=max_period,
    )
    assert out2.shape == (N2, time_embed_dim)
    assert jnp.allclose(out2, ref2, atol=1e-5, rtol=1e-5), "mismatch vs reference (N=300)"

    print("KERNEL_OK")
</pallas_src>

<mosaic_0001>
module attributes {stable_mosaic.version = 11 : i64} {
  func.func @_fourier_mlp_kernel(%arg0: i32, %arg1: memref<8x1xf32, #tpu.memory_space<vmem>>, %arg2: memref<1x16xf32, #tpu.memory_space<vmem>>, %arg3: memref<16x128xf32, #tpu.memory_space<vmem>>, %arg4: memref<16x128xf32, #tpu.memory_space<vmem>>, %arg5: memref<1x128xf32, #tpu.memory_space<vmem>>, %arg6: memref<128x128xf32, #tpu.memory_space<vmem>>, %arg7: memref<1x128xf32, #tpu.memory_space<vmem>>, %arg8: memref<8x128xf32, #tpu.memory_space<vmem>>) attributes {dimension_semantics = [#tpu.dimension_semantics<parallel>], iteration_bounds = array<i64: 1>, scalar_prefetch = 0 : i64, scratch_operands = 0 : i64, tpu.core_type = #tpu.core_type<tc>, window_params = [{transform_indices = @transform_0, window_bounds = array<i64: 8, 1>}, {pipeline_mode = #tpu.pipeline_mode<synchronous>, transform_indices = @transform_1, window_bounds = array<i64: 1, 16>}, {pipeline_mode = #tpu.pipeline_mode<synchronous>, transform_indices = @transform_2, window_bounds = array<i64: 16, 128>}, {pipeline_mode = #tpu.pipeline_mode<synchronous>, transform_indices = @transform_3, window_bounds = array<i64: 16, 128>}, {pipeline_mode = #tpu.pipeline_mode<synchronous>, transform_indices = @transform_4, window_bounds = array<i64: 1, 128>}, {pipeline_mode = #tpu.pipeline_mode<synchronous>, transform_indices = @transform_5, window_bounds = array<i64: 128, 128>}, {pipeline_mode = #tpu.pipeline_mode<synchronous>, transform_indices = @transform_6, window_bounds = array<i64: 1, 128>}, {transform_indices = @transform_7, window_bounds = array<i64: 8, 128>}]} {
    %c0 = arith.constant 0 : index
    %c0_0 = arith.constant 0 : index
    %0 = vector.load %arg1[%c0, %c0_0] : memref<8x1xf32, #tpu.memory_space<vmem>>, vector<8x1xf32>
    %c0_1 = arith.constant 0 : index
    %c0_2 = arith.constant 0 : index
    %1 = vector.load %arg2[%c0_1, %c0_2] : memref<1x16xf32, #tpu.memory_space<vmem>>, vector<1x16xf32>
    %2 = vector.broadcast %0 : vector<8x1xf32> to vector<8x16xf32>
    %3 = vector.broadcast %1 : vector<1x16xf32> to vector<8x16xf32>
    %4 = arith.mulf %2, %3 : vector<8x16xf32>
    %5 = math.cos %4 : vector<8x16xf32>
    %6 = math.sin %4 : vector<8x16xf32>
    %c0_3 = arith.constant 0 : index
    %c0_4 = arith.constant 0 : index
    %7 = vector.load %arg3[%c0_3, %c0_4] : memref<16x128xf32, #tpu.memory_space<vmem>>, vector<16x128xf32>
    %cst = arith.constant dense<0.000000e+00> : vector<8x128xf32>
    %8 = tpu.matmul %5, %7, %cst {dimension_numbers = #tpu.dot_dimension_numbers<[1], [0], [0], [1], [0, 0, 1, 1], [], []>} : vector<8x16xf32>, vector<16x128xf32>, vector<8x128xf32> -> vector<8x128xf32>
    %c0_5 = arith.constant 0 : index
    %c0_6 = arith.constant 0 : index
    %9 = vector.load %arg4[%c0_5, %c0_6] : memref<16x128xf32, #tpu.memory_space<vmem>>, vector<16x128xf32>
    %cst_7 = arith.constant dense<0.000000e+00> : vector<8x128xf32>
    %10 = tpu.matmul %6, %9, %cst_7 {dimension_numbers = #tpu.dot_dimension_numbers<[1], [0], [0], [1], [0, 0, 1, 1], [], []>} : vector<8x16xf32>, vector<16x128xf32>, vector<8x128xf32> -> vector<8x128xf32>
    %11 = arith.addf %8, %10 : vector<8x128xf32>
    %c0_8 = arith.constant 0 : index
    %c0_9 = arith.constant 0 : index
    %12 = vector.load %arg5[%c0_8, %c0_9] : memref<1x128xf32, #tpu.memory_space<vmem>>, vector<1x128xf32>
    %13 = vector.broadcast %12 : vector<1x128xf32> to vector<8x128xf32>
    %14 = arith.addf %11, %13 : vector<8x128xf32>
    %cst_10 = arith.constant 0.000000e+00 : f32
    %15 = vector.broadcast %cst_10 : f32 to vector<8x128xf32>
    %16 = arith.maximumf %14, %15 : vector<8x128xf32>
    %c0_11 = arith.constant 0 : index
    %c0_12 = arith.constant 0 : index
    %17 = vector.load %arg6[%c0_11, %c0_12] : memref<128x128xf32, #tpu.memory_space<vmem>>, vector<128x128xf32>
    %cst_13 = arith.constant dense<0.000000e+00> : vector<8x128xf32>
    %18 = tpu.matmul %16, %17, %cst_13 {dimension_numbers = #tpu.dot_dimension_numbers<[1], [0], [0], [1], [0, 0, 1, 1], [], []>} : vector<8x128xf32>, vector<128x128xf32>, vector<8x128xf32> -> vector<8x128xf32>
    %c0_14 = arith.constant 0 : index
    %c0_15 = arith.constant 0 : index
    %19 = vector.load %arg7[%c0_14, %c0_15] : memref<1x128xf32, #tpu.memory_space<vmem>>, vector<1x128xf32>
    %20 = vector.broadcast %19 : vector<1x128xf32> to vector<8x128xf32>
    %21 = arith.addf %18, %20 : vector<8x128xf32>
    %c0_16 = arith.constant 0 : index
    %c0_17 = arith.constant 0 : index
    %22 = vector.load %arg8[%c0_16, %c0_17] : memref<8x128xf32, #tpu.memory_space<vmem>>, vector<8x128xf32>
    tpu.vector_store %arg8[%c0_16, %c0_17], %21 {strides = array<i32>} : memref<8x128xf32, #tpu.memory_space<vmem>>, vector<8x128xf32>,
    return
  }
  func.func @transform_0(%arg0: i32) -> (i32, i32) {
    %c0_i32 = arith.constant 0 : i32
    %c0_i32_0 = arith.constant 0 : i32
    return %arg0, %c0_i32 : i32, i32
  }
  func.func @transform_1(%arg0: i32) -> (i32, i32) {
    %c0_i32 = arith.constant 0 : i32
    %c0_i32_0 = arith.constant 0 : i32
    %c0_i32_1 = arith.constant 0 : i32
    return %c0_i32, %c0_i32_0 : i32, i32
  }
  func.func @transform_2(%arg0: i32) -> (i32, i32) {
    %c0_i32 = arith.constant 0 : i32
    %c0_i32_0 = arith.constant 0 : i32
    %c0_i32_1 = arith.constant 0 : i32
    return %c0_i32, %c0_i32_0 : i32, i32
  }
  func.func @transform_3(%arg0: i32) -> (i32, i32) {
    %c0_i32 = arith.constant 0 : i32
    %c0_i32_0 = arith.constant 0 : i32
    %c0_i32_1 = arith.constant 0 : i32
    return %c0_i32, %c0_i32_0 : i32, i32
  }
  func.func @transform_4(%arg0: i32) -> (i32, i32) {
    %c0_i32 = arith.constant 0 : i32
    %c0_i32_0 = arith.constant 0 : i32
    %c0_i32_1 = arith.constant 0 : i32
    return %c0_i32, %c0_i32_0 : i32, i32
  }
  func.func @transform_5(%arg0: i32) -> (i32, i32) {
    %c0_i32 = arith.constant 0 : i32
    %c0_i32_0 = arith.constant 0 : i32
    %c0_i32_1 = arith.constant 0 : i32
    return %c0_i32, %c0_i32_0 : i32, i32
  }
  func.func @transform_6(%arg0: i32) -> (i32, i32) {
    %c0_i32 = arith.constant 0 : i32
    %c0_i32_0 = arith.constant 0 : i32
    %c0_i32_1 = arith.constant 0 : i32
    return %c0_i32, %c0_i32_0 : i32, i32
  }
  func.func @transform_7(%arg0: i32) -> (i32, i32) {
    %c0_i32 = arith.constant 0 : i32
    %c0_i32_0 = arith.constant 0 : i32
    return %arg0, %c0_i32 : i32, i32
  }
}

</mosaic_0001>

<bundles_post_ra>
// kernel: tpu_custom_call.1
= control target key start
LH: loop header
LB: loop body
LE: loop exit
PB: predicated region body
PF: predicated region fallthrough
CT: control target
= control target key end

     0   :  { %12 = vsyncpa [#allocation3], 0  ;;  %s783_s0 = inlined_call_operand.vmem [shape: f32[8,1], index: 0, kind: input, shape index: {}]   ;;  %s784_s1 = inlined_call_operand.vmem [shape: f32[1,16], index: 1, kind: input, shape index: {}]   ;;  %s785_s2 = inlined_call_operand.hbm [shape: f32[16,128], index: 2, kind: input, shape index: {}]   ;;  %s786_s3 = inlined_call_operand.hbm [shape: f32[16,128], index: 3, kind: input, shape index: {}]   ;;  %s787_s4 = inlined_call_operand.vmem [shape: f32[1,128], index: 4, kind: input, shape index: {}]   ;;  %s788_s5 = inlined_call_operand.hbm [shape: f32[128,128], index: 5, kind: input, shape index: {}]   ;;  %s789_s6 = inlined_call_operand.vmem [shape: f32[1,128], index: 6, kind: input, shape index: {}]   ;;  %s790_s7 = inlined_call_operand.hbm [shape: f32[8,128], index: 7, kind: output, shape index: {}]  }
   0x1   :  { %13 = vsyncpa [#allocation6], 0 }
   0x2   :  { %14 = vsyncpa [#allocation4], 0  ;;  %s36_s26 = sshll.u32 %s786_s3, 4  ;;  %s637_s27 = smov [#allocation5]   ;;  %s37_s26 = int_to_ptr.hbm [resolvable:$true] %s36_s26 }
   0x3   :  { %s38_s28 = sshll.u32 %s637_s27, 4  ;;  %s23_s8 = sshll.u32 %s785_s2, 4  ;;  %s39_s28 = int_to_ptr.vmem [resolvable:$true] %s38_s28  ;;  %s24_s8 = int_to_ptr.hbm [resolvable:$true] %s23_s8 }
   0x4   :  { %s638_s9 = smov 128   ;;  %s639_s10 = smov 8  }
   0x5   :  { %44 = dma.hbm_to_vmem [thread:$0]  %s37_s26, 256, %s39_s28, [#allocation6], %s638_s9, %s638_s9, %s639_s10  }
   0x6   :  { %s640_s11 = smov [#allocation2]   ;;  %s51_s15 = sshll.u32 %s788_s5, 4  ;;  %s52_s15 = int_to_ptr.hbm [resolvable:$true] %s51_s15 }
   0x7   :  { %s25_s12 = sshll.u32 %s640_s11, 4  ;;  %s641_s3 = smov [#allocation7]   ;;  %s26_s12 = int_to_ptr.vmem [resolvable:$true] %s25_s12 }
   0x8   :  { %31 = dma.hbm_to_vmem [thread:$0]  %s24_s8, 256, %s26_s12, [#allocation3], %s638_s9, %s638_s9, %s639_s10  }
   0x9   :  { %s53_s16 = sshll.u32 %s641_s3, 4  ;;  %s54_s16 = int_to_ptr.vmem [resolvable:$true] %s53_s16 }
   0xa   :  { %59 = dma.hbm_to_vmem [thread:$0]  %s52_s15, 2048, %s54_s16, [#allocation6], %s638_s9, %s638_s9, %s639_s10  }
   0xb   :  { %631 = dma.done.wait [#allocation3], 256  }
   0xc   :  { %632 = vsyncadd [#allocation3], 4294967040 }
   0xd   :  { %633 = dma.done.wait [#allocation6], 2304  }
   0xe   :  { %634 = vsyncadd [#allocation6], 4294964992  ;;  %v642_v0 = vmov 0   ;;  %v74_v1 = vld [vmem:[%s783_s0] sm:$0xff]  ;;  %v397_v3 = vld [vmem:[#allocation5 + $0x8] sm:$0xff]  ;;  %s649_s21 = smov [#allocation8]  }
   0xf   :  { %531 = vset.pattern.permute.xlu0 %v642_v0  ;;  %v532_v2 = vld [vmem:[%s784_s1] ss:$0 sm:$0xff]  ;;  %v395_v4 = vld [vmem:[#allocation2 + $0x8] sm:$0xff]  ;;  %v396_v5 = vld [vmem:[#allocation5] sm:$0xff]  ;;  %416 = vmatpush.msra.mxu0 %v397_v3  ;;  %v643_v20 = vmov 683565275  }
  0x10   :  { %78 = vperm.xlu0 %531, %v74_v1   ;;  %439 = vmatpush.msra.mxu1 %v395_v4  ;;  %v394_v7 = vld [vmem:[#allocation2] sm:$0xff]  ;;  %v644_v22 = vmov 2475754826   ;;  %v645_v25 = vmov 2131351028   ;;  %s497_s22 = sshll.u32 %s649_s21, 4  ;;  %s498_s22 = int_to_ptr.vmem [resolvable:$true] %s497_s22 }
  0x11   :  { %417 = vmatpush.msra.mxu0 %v396_v5  ;;  %v646_v28 = vmov 2102212464   ;;  %v647_v31 = vmov 920167782   ;;  %v648_v34 = vmov 1326507024  }
  0x12   :  { %440 = vmatpush.msra.mxu1 %v394_v7  ;;  %s499_s25 = sshll.u32 %s790_s7, 4  ;;  %s500_s25 = int_to_ptr.hbm [resolvable:$true] %s499_s25 }
  0x82   :  { %v79_v6 = vpop.permute.xlu0 %78 }
  0x83   :  { %v706_v8 = vmul.f32 %v532_v2, %v79_v6 }
  0x85   :  { %v88_v9 = vand.u32 2139095040, %v706_v8  ;;  %v85_v12 = vand.u32 2147483647, %v706_v8  ;;  %vm87_vm12 = vcmp.lt.s32.totalorder %v706_v8, 0 }
  0x87   :  { %v89_v10 = vshrl.u32 %v88_v9, 23  ;;  %v92_v14 = vand.u32 8388607, %v85_v12  ;;  %vm764_vm13 = vcmp.le.f32.partialorder %v85_v12, 0.7853982 }
  0x89   :  { %v510_v11 = vadd.s32 4294967169, %v89_v10  ;;  %v93_v18 = vor.u32 8388608, %v92_v14 }
  0x8b   :  { %v95_v13 = vadd.s32 1, %v510_v11  ;;  %v723_v41 = vshll.u32 %v93_v18, 8 }
  0x8d   :  { %vm96_vm0 = vcmp.gt.s32.totalorder %v95_v13, 0  ;;  %v134_v50 = vand.u32 65535, %v723_v41  ;;  %v135_v55 = vshrl.u32 %v723_v41, 16 }
  0x8e   :  { %v97_v15 = vsel %vm96_vm0, %v95_v13, 0 }
  0x8f   :  { %v99_v16 = vand.u32 31, %v97_v15  ;;  %v714_v19 = vshrl.u32 %v97_v15, 5 }
  0x91   :  { %v712_v17 = vsub.s32 32, %v99_v16  ;;  %v102_v21 = vshll.u32 %v643_v20, %v99_v16  ;;  %v105_v23 = vshll.u32 %v644_v22, %v99_v16  ;;  %v108_v27 = vshll.u32 %v645_v25, %v99_v16 }
  0x92   :  { %v111_v30 = vshll.u32 %v646_v28, %v99_v16  ;;  %v114_v33 = vshll.u32 %v647_v31, %v99_v16  ;;  %vm117_vm1 = vcmp.lt.s32.totalorder %v714_v19, 1  ;;  %vm120_vm2 = vcmp.lt.s32.totalorder %v714_v19, 4 }
  0x93   :  { %v103_v24 = vshrl.u32 %v644_v22, %v712_v17  ;;  %v106_v26 = vshrl.u32 %v645_v25, %v712_v17  ;;  %v109_v29 = vshrl.u32 %v646_v28, %v712_v17  ;;  %v112_v32 = vshrl.u32 %v647_v31, %v712_v17 }
  0x94   :  { %v115_v35 = vshrl.u32 %v648_v34, %v712_v17  ;;  %vm119_vm3 = vcmp.lt.s32.totalorder %v714_v19, 3  ;;  %vm118_vm4 = vcmp.lt.s32.totalorder %v714_v19, 2  ;;  %v101_v14 = vshrl.u32 %v643_v20, %v712_v17 }
  0x95   :  { %v104_v36 = vor.u32 %v103_v24, %v102_v21  ;;  %v107_v37 = vor.u32 %v106_v26, %v105_v23  ;;  %v110_v38 = vor.u32 %v109_v29, %v108_v27  ;;  %v113_v39 = vor.u32 %v112_v32, %v111_v30 }
  0x96   :  { %v116_v40 = vor.u32 %v115_v35, %v114_v33 }
  0x97   :  { %v125_v42 = vsel %vm117_vm1, %v104_v36, %v107_v37  ;;  %v129_v43 = vsel %vm117_vm1, %v107_v37, %v110_v38  ;;  %v126_v44 = vsel %vm120_vm2, %v113_v39, 920167782  ;;  %v122_v7 = vsel %vm120_vm2, %v110_v38, 2102212464 }
  0x98   :  { %v130_v45 = vsel %vm120_vm2, %v116_v40, 1326507024  ;;  %v127_v46 = vsel %vm119_vm3, %v110_v38, %v126_v44  ;;  %v121_v24 = vsel %vm117_vm1, %v101_v14, %v104_v36  ;;  %v123_v25 = vsel %vm119_vm3, %v107_v37, %v122_v7 }
  0x99   :  { %v131_v47 = vsel %vm119_vm3, %v113_v39, %v130_v45  ;;  %v128_v48 = vsel %vm118_vm4, %v125_v42, %v127_v46  ;;  %v124_v17 = vsel %vm118_vm4, %v121_v24, %v123_v25  ;;  %v455_v24 = vld [vmem:[#allocation7 + $0x20] sm:$0xff] }
  0x9a   :  { %v132_v49 = vsel %vm118_vm4, %v129_v43, %v131_v47  ;;  %v158_v53 = vand.u32 65535, %v128_v48  ;;  %v159_v54 = vshrl.u32 %v128_v48, 16  ;;  %v178_v32 = vmul.u32 %v723_v41, %v124_v17 }
  0x9b   :  { %v136_v51 = vand.u32 65535, %v132_v49  ;;  %v137_v52 = vshrl.u32 %v132_v49, 16  ;;  %vm398_vm4 = vcmask 130048  }
  0x9c   :  { %v161_v57 = vmul.u32 %v159_v54, %v134_v50  ;;  %v162_v59 = vmul.u32 %v158_v53, %v135_v55  ;;  %v160_v62 = vmul.u32 %v158_v53, %v134_v50  ;;  %v163_v2 = vmul.u32 %v159_v54, %v135_v55  ;;  %v464_v54 = vld [vmem:[#allocation7 + $0x68] sm:$0xff] }
  0x9d   :  { %v139_v56 = vmul.u32 %v137_v52, %v134_v50  ;;  %v140_v58 = vmul.u32 %v136_v51, %v135_v55  ;;  %v138_v60 = vmul.u32 %v136_v51, %v134_v50  ;;  %v141_v1 = vmul.u32 %v137_v52, %v135_v55  ;;  %v466_v51 = vld [vmem:[#allocation7 + $0x78] sm:$0xff]  ;;  %v465_v52 = vld [vmem:[#allocation7 + $0x70] sm:$0xff] }
  0x9e   :  { %v164_v63 = vshll.u32 %v161_v57, 16  ;;  %v166_v4 = vshll.u32 %v162_v59, 16  ;;  %v165_v22 = vshrl.u32 %v161_v57, 16  ;;  %v167_v28 = vshrl.u32 %v162_v59, 16  ;;  %471 = vmatpush.msra.mxu2 %v466_v51  ;;  %v463_v57 = vld [vmem:[#allocation7 + $0x60] sm:$0xff]  ;;  %v462_v59 = vld [vmem:[#allocation7 + $0x58] sm:$0xff] }
  0x9f   :  { %v142_v61 = vshll.u32 %v139_v56, 16  ;;  %v144_v3 = vshll.u32 %v140_v58, 16  ;;  %v143_v18 = vshrl.u32 %v139_v56, 16  ;;  %v145_v26 = vshrl.u32 %v140_v58, 16 }
  0xa0   :  { %vm168_vm6 = vc.u32 %v160_v62, %v164_v63  ;;  %v170_v6 = vadd.s32 %v164_v63, %v160_v62  ;;  %472 = vmatpush.msra.mxu2 %v465_v52 }
  0xa1   :  { %vm146_vm5 = vc.u32 %v138_v60, %v142_v61  ;;  %v148_v5 = vadd.s32 %v142_v61, %v138_v60  ;;  %v169_v10 = vsel %vm168_vm6, 1, %v642_v0  ;;  %v461_v61 = vld [vmem:[#allocation7 + $0x50] sm:$0xff] }
  0xa2   :  { %v147_v9 = vsel %vm146_vm5, 1, %v642_v0  ;;  %v171_v13 = vadd.s32 %v169_v10, %v163_v2  ;;  %vm172_vm8 = vc.u32 %v170_v6, %v166_v4  ;;  %v174_v30 = vadd.s32 %v170_v6, %v166_v4  ;;  %473 = vmatpush.msra.mxu2 %v464_v54  ;;  %v458_v10 = vld [vmem:[#allocation7 + $0x38] sm:$0xff] }
  0xa3   :  { %v149_v11 = vadd.s32 %v147_v9, %v141_v1  ;;  %vm150_vm7 = vc.u32 %v148_v5, %v144_v3  ;;  %v173_v16 = vsel %vm172_vm8, 1, %v642_v0  ;;  %v460_v3 = vld [vmem:[#allocation7 + $0x48] sm:$0xff]  ;;  %v459_v5 = vld [vmem:[#allocation7 + $0x40] sm:$0xff]  ;;  %vm228_vm5 = vweird.f32 %v706_v8 }
  0xa4   :  { %v151_v15 = vsel %vm150_vm7, 1, %v642_v0  ;;  %v175_v23 = vadd.s32 %v173_v16, %v171_v13  ;;  %474 = vmatpush.msra.mxu2 %v463_v57  ;;  %v457_v13 = vld [vmem:[#allocation7 + $0x30] sm:$0xff] }
  0xa5   :  { %v153_v21 = vadd.s32 %v151_v15, %v149_v11 }
  0xa6   :  { %v176_v29 = vadd.s32 %v175_v23, %v165_v22  ;;  %475 = vmatpush.msra.mxu2 %v462_v59 }
  0xa7   :  { %v154_v27 = vadd.s32 %v153_v21, %v143_v18  ;;  %v456_v18 = vld [vmem:[#allocation7 + $0x28] sm:$0xff] }
  0xa8   :  { %v177_v0 = vadd.s32 %v176_v29, %v167_v28  ;;  %476 = vmatpush.msra.mxu2 %v461_v61 }
  0xa9   :  { %v155_v20 = vadd.s32 %v154_v27, %v145_v26 }
  0xaa   :  { %v181_v31 = vadd.s32 1, %v177_v0  ;;  %477 = vmatpush.msra.mxu2 %v460_v3 }
  0xab   :  { %vm180_vm9 = vc.u32 %v155_v20, %v174_v30  ;;  %v179_v44 = vadd.s32 %v174_v30, %v155_v20 }
  0xac   :  { %v182_v33 = vsel %vm180_vm9, %v181_v31, %v177_v0  ;;  %478 = vmatpush.msra.mxu2 %v459_v5 }
  0xad   :  { %v183_v34 = vadd.s32 %v182_v33, %v178_v32 }
  0xae   :  { %479 = vmatpush.msra.mxu2 %v458_v10 }
  0xaf   :  { %v184_v35 = vadd.s32 536870912, %v183_v34 }
  0xb0   :  { %480 = vmatpush.msra.mxu2 %v457_v13 }
  0xb1   :  { %v185_v36 = vshrl.u32 %v184_v35, 30 }
  0xb2   :  { %481 = vmatpush.msra.mxu2 %v456_v18 }
  0xb3   :  { %v186_v38 = vshll.u32 %v185_v36, 30  ;;  %v209_v1 = vsub.s32 4, %v185_v36 }
  0xb4   :  { %482 = vmatpush.msra.mxu2 %v455_v24 }
  0xb5   :  { %v187_v37 = vsub.s32 %v183_v34, %v186_v38  ;;  %v210_v9 = vsel %vm87_vm12, %v209_v1, %v185_v36 }
  0xb6   :  { %v212_v14 = vsel %vm764_vm13, 0, %v210_v9 }
  0xb7   :  { %vm188_vm10 = vcmp.lt.s32.totalorder %v187_v37, 0  ;;  %v189_v39 = vsub.s32 0, %v187_v37  ;;  %v383_v23 = vadd.s32 3, %v212_v14  ;;  %v229_v29 = vand.u32 3, %v212_v14 }
  0xb9   :  { %v190_v40 = vsel %vm188_vm10, %v189_v39, %v187_v37  ;;  %v384_v17 = vand.u32 3, %v383_v23  ;;  %vm230_vm14 = vcmp.lt.s32.totalorder %v229_v29, 2  ;;  %vm231_vm15 = vcmp.eq.s32.totalorder %v229_v29, 0  ;;  %v454_v39 = vld [vmem:[#allocation7 + $0x18] sm:$0xff] }
  0xba   :  { %v191_v42 = vclz %v190_v40  ;;  %vm234_vm0 = vcmp.eq.s32.totalorder %v229_v29, 2  ;;  %v453_v40 = vld [vmem:[#allocation7 + $0x10] sm:$0xff]  ;;  %483 = vmatpush.msra.mxu2 %v454_v39 }
  0xbb   :  { %vm385_vm1 = vcmp.lt.s32.totalorder %v384_v17, 2  ;;  %vm386_vm2 = vcmp.eq.s32.totalorder %v384_v17, 0  ;;  %vm389_vm3 = vcmp.eq.s32.totalorder %v384_v17, 2 }
  0xbc   :  { %v511_v43 = vadd.s32 4294967294, %v191_v42  ;;  %v452_v42 = vld [vmem:[#allocation7 + $0x8] sm:$0xff]  ;;  %484 = vmatpush.msra.mxu2 %v453_v40 }
  0xbe   :  { %vm512_vm11 = vcmp.lt.s32.totalorder %v511_v43, 0  ;;  %485 = vmatpush.msra.mxu2 %v452_v42 }
  0xbf   :  { %v194_v19 = vsel %vm512_vm11, 0, %v511_v43  ;;  %v451_v43 = vld [vmem:[#allocation7] sm:$0xff] }
  0xc0   :  { %v195_v45 = vsub.s32 32, %v194_v19  ;;  %v199_v46 = vsub.s32 4294967266, %v194_v19  ;;  %v196_v47 = vshll.u32 %v187_v37, %v194_v19  ;;  %486 = vmatpush.msra.mxu2 %v451_v43  ;;  %v533_v19 = vld [vmem:[%s787_s4] ss:$0 sm:$0xff] }
  0xc2   :  { %v197_v48 = vshrl.u32 %v179_v44, %v195_v45  ;;  %v200_v49 = vadd.s32 127, %v199_v46 }
  0xc4   :  { %v198_v41 = vor.u32 %v197_v48, %v196_v47  ;;  %v201_v50 = vshll.u32 %v200_v49, 23  ;;  %v534_v48 = vld [vmem:[%s789_s6] ss:$0 sm:$0xff] }
  0xc6   :  { %v202_v53 = vor.u32 4788187, %v201_v50  ;;  %v205_v56 = vcvt.s32.f32 %v198_v41 }
  0xc8   :  { %v203_v55 = vand.u32 2147483647, %v202_v53 }
  0xca   :  { %v206_v58 = vmul.f32 %v205_v56, %v203_v55 }
  0xcc   :  { %v207_v60 = vxor.u32 2147483648, %v206_v58 }
  0xce   :  { %v208_v63 = vsel %vm87_vm12, %v207_v60, %v206_v58 }
  0xcf   :  { %v211_v2 = vsel %vm764_vm13, %v706_v8, %v208_v63 }
  0xd0   :  { %v213_v4 = vmul.f32 %v211_v2, %v211_v2 }
  0xd2   :  { %v214_v6 = vmul.f32 -0.001358992, %v213_v4  ;;  %v221_v7 = vmul.f32 -0.00019511016, %v213_v4 }
  0xd4   :  { %v215_v12 = vadd.f32 0.041655596, %v214_v6  ;;  %v222_v11 = vadd.f32 0.008332121, %v221_v7 }
  0xd6   :  { %v216_v15 = vmul.f32 %v215_v12, %v213_v4  ;;  %v223_v16 = vmul.f32 %v222_v11, %v213_v4 }
  0xd8   :  { %v217_v21 = vadd.f32 -0.4999988, %v216_v15  ;;  %v224_v22 = vadd.f32 -0.16666654, %v223_v16 }
  0xda   :  { %v218_v25 = vmul.f32 %v217_v21, %v213_v4  ;;  %v225_v26 = vmul.f32 %v224_v22, %v213_v4 }
  0xdc   :  { %v219_v27 = vadd.f32 1.0, %v218_v25  ;;  %v226_v28 = vadd.f32 1.0, %v225_v26 }
  0xde   :  { %v227_v20 = vmul.f32 %v226_v28, %v211_v2  ;;  %v235_v30 = vxor.u32 2147483648, %v219_v27 }
  0xe0   :  { %v232_v0 = vxor.u32 2147483648, %v227_v20  ;;  %v391_v32 = vsel %vm389_vm3, %v235_v30, %v227_v20  ;;  %v236_v34 = vsel %vm234_vm0, %v235_v30, %v227_v20 }
  0xe2   :  { %v388_v31 = vsel %vm386_vm2, %v219_v27, %v232_v0  ;;  %v233_v33 = vsel %vm231_vm15, %v219_v27, %v232_v0 }
  0xe3   :  { %v392_v35 = vsel %vm385_vm1, %v388_v31, %v391_v32  ;;  %v237_v36 = vsel %vm230_vm14, %v233_v33, %v236_v34 }
  0xe4   :  { %v393_v38 = vsel %vm228_vm5, nan, %v392_v35  ;;  %v238_v37 = vsel %vm228_vm5, nan, %v237_v36 }
  0xe5   :  { %516 = vmatmul.msk.f32.vlgmr.msra.gmra.mxu0 %vm398_vm4, %v393_v38  ;;  %517 = vmatmul.msk.f32.vlgmr.msra.gmra.mxu1 %vm398_vm4, %v238_v37 }
 0x162   :  { %v419_v44 = vpop.f32.mrf.mxu0  ;;  %v442_v8 = vpop.f32.mrf.mxu1 }
 0x163   :  { %v443_v45 = vadd.f32 %v442_v8, %v419_v44 }
 0x165   :  { %v449_v46 = vadd.f32 %v533_v19, %v443_v45 }
 0x167   :  { %v450_v47 = vmax.f32 %v449_v46, 0.0 }
 0x169   :  { %487 = vmatmul.f32.vlgmr.msra.gmra.mxu2 %v450_v47 }
 0x1ec   :  { %v488_v49 = vpop.f32.mrf.mxu2 }
 0x1ed   :  { %v489_v41 = vadd.f32 %v534_v48, %v488_v49 }
 0x1ef   :  { %491 = vst [vmem:[#allocation8] sm:$0xff] %v489_v41 }
 0x1f0   :  { %502 = dma.vmem_to_hbm [thread:$0]  %s498_s22, 128, %s500_s25, [#allocation4]  }
 0x1f1   :  { %635 = dma.done.wait [#allocation4], 128  }
 0x1f2   :  { %636 = vsyncadd [#allocation4], 4294967168 }
 0x1f3   :  { %507 = vsyncpa [#allocation3], 1 }
 0x1f4   :  { %508 = vsyncpa [#allocation6], 1 }
 0x1f5   :  { %509 = vsyncpa [#allocation4], 1 }

</bundles_post_ra>
